<compile_context>
chip_gen: v5e
topology: v5e:2x2
jax: 0.10.0
libtpu: 0.0.40
codegen_flags: <defaults>
</compile_context>

<pallas_src>
import functools

import jax
import jax.numpy as jnp
from jax import lax
from jax.experimental import pallas as pl
from jax.experimental.pallas import tpu as pltpu

_LANES = 128
_BLOCK_ROWS = 4096      # 4096 x 128 f32 = 2 MiB per input block
_CORE_SPLITS = 2        # leading "parallel" grid axis (both TCs on v7x)


def _one_minus_sigmoid(x):
    # 1 - sigmoid(x) == 0.5 - 0.5 * tanh(0.5 * x)  (single EUP op, no divide)
    return 0.5 - 0.5 * jnp.tanh(0.5 * x)


def _invdice_single_kernel(o_ref, t_ref, loss_ref, *, smooth):
    # Whole (small) problem in one VMEM block: no grid, no accumulator.
    o = o_ref[...].astype(jnp.float32)
    t = t_ref[...].astype(jnp.float32)
    iflat = _one_minus_sigmoid(o)
    tflat = 1.0 - t
    inter = jnp.sum(iflat * tflat)
    denom = jnp.sum(iflat + tflat)
    loss = 1.0 - (2.0 * inter + smooth) / (denom + smooth)
    loss_ref[...] = jnp.full((1, 1), loss, jnp.float32)


def _invdice_tiled_kernel(o_ref, t_ref, part_ref, *, n_rows, block_rows,
                          blocks_per_split, needs_mask):
    p = pl.program_id(0)   # "parallel" core-split axis
    i = pl.program_id(1)   # "arbitrary" sequential reduction axis

    @pl.when(i == 0)
    def _():
        part_ref[...] = jnp.zeros(part_ref.shape, part_ref.dtype)

    o = o_ref[...].astype(jnp.float32)
    t = t_ref[...].astype(jnp.float32)

    iflat = _one_minus_sigmoid(o)
    tflat = 1.0 - t

    if needs_mask:
        # Rows past the end of the input (ragged last block / over-coverage
        # blocks of the core split) contribute nothing; the where() also
        # discards any garbage/NaN read from pallas-padded regions.
        blk = p * blocks_per_split + i
        row = blk * block_rows + lax.broadcasted_iota(jnp.int32, o.shape, 0)
        valid = row < n_rows
        iflat = jnp.where(valid, iflat, 0.0)
        tflat = jnp.where(valid, tflat, 0.0)

    # In-block partial reduce across vregs (pure VPU adds, no XLU):
    # (block_rows, 128) -> (8, 128), accumulated straight into the resident
    # output block. Cross-lane reduce deferred to the wrapper epilogue.
    prod = (iflat * tflat).reshape(-1, 8, _LANES)
    den = (iflat + tflat).reshape(-1, 8, _LANES)
    part_ref[0, 0] += jnp.sum(prod, axis=0)
    part_ref[0, 1] += jnp.sum(den, axis=0)


def inv_dice_loss(logits, targets, *, smooth=1e-10, block_rows=_BLOCK_ROWS):
    assert logits.shape == targets.shape
    n = logits.size

    lo = logits.reshape(-1)
    tg = targets.reshape(-1)

    rem = n % _LANES
    if rem:
        # TODO(synk): for n % 128 != 0 this still materializes a padded copy;
        # fold the <128-element remainder into a tiny separate partial-sum
        # path instead. Every 128-aligned size below runs zero-copy.
        pad = _LANES - rem
        lo = jnp.concatenate([lo, jnp.full((pad,), jnp.inf, lo.dtype)])
        tg = jnp.concatenate([tg, jnp.ones((pad,), tg.dtype)])

    rows = lo.shape[0] // _LANES
    lo2 = lo.reshape(rows, _LANES)
    tg2 = tg.reshape(rows, _LANES)

    if rows <= block_rows:
        # Small input: single block, no grid / pipeline / accumulator.
        kernel = functools.partial(_invdice_single_kernel, smooth=smooth)
        loss = pl.pallas_call(
            kernel,
            out_shape=jax.ShapeDtypeStruct((1, 1), jnp.float32),
        )(lo2, tg2)
        return loss[0, 0]

    num_blocks = pl.cdiv(rows, block_rows)
    bps = pl.cdiv(num_blocks, _CORE_SPLITS)            # blocks per core split
    needs_mask = (_CORE_SPLITS * bps * block_rows) != rows
    last_block = num_blocks - 1

    def in_map(p, i):
        # Clamp so the over-coverage blocks of the core split stay in bounds;
        # their (duplicate) data is zeroed by the in-kernel mask.
        return (jnp.minimum(p * bps + i, last_block), 0)

    kernel = functools.partial(
        _invdice_tiled_kernel, n_rows=rows, block_rows=block_rows,
        blocks_per_split=bps, needs_mask=needs_mask)

    partials = pl.pallas_call(
        kernel,
        out_shape=jax.ShapeDtypeStruct((_CORE_SPLITS, 2, 8, _LANES),
                                       jnp.float32),
        grid_spec=pltpu.PrefetchScalarGridSpec(
            num_scalar_prefetch=0,
            grid=(_CORE_SPLITS, bps),
            in_specs=[
                pl.BlockSpec((block_rows, _LANES), in_map),
                pl.BlockSpec((block_rows, _LANES), in_map),
            ],
            out_specs=pl.BlockSpec((1, 2, 8, _LANES),
                                   lambda p, i: (p, 0, 0, 0)),
        ),
        compiler_params=pltpu.CompilerParams(
            # carried accumulator -> sequential ("arbitrary") reduction axis;
            # leading split axis "parallel" uses both TensorCores on v7x.
            dimension_semantics=("parallel", "arbitrary"),
        ),
    )(lo2, tg2)

    inter = jnp.sum(partials[:, 0])
    denom = jnp.sum(partials[:, 1])
    return 1.0 - (2.0 * inter + smooth) / (denom + smooth)


def _ref_inv_dice(logits, targets, smooth=1e-10):
    s = jax.nn.sigmoid(logits.astype(jnp.float32))
    iflat = (1.0 - s).reshape(-1)
    tflat = (1.0 - targets.astype(jnp.float32)).reshape(-1)
    inter = jnp.sum(iflat * tflat)
    return 1.0 - (2.0 * inter + smooth) / (jnp.sum(iflat) + jnp.sum(tflat) + smooth)


def _check(loss, ref):
    assert jnp.allclose(loss, ref, rtol=1e-5, atol=1e-6), (loss, ref)


if __name__ == "__main__":
    key = jax.random.PRNGKey(0)
    k1, k2, k3, k4, k5, k6 = jax.random.split(key, 6)

    # small segmentation-style inputs: (batch, channels, H, W)
    shape = (2, 4, 16, 16)
    logits = jax.random.normal(k1, shape, dtype=jnp.float32)
    targets = jax.random.bernoulli(k2, 0.5, shape).astype(jnp.float32)
    loss = jax.block_until_ready(inv_dice_loss(logits, targets))
    _check(loss, _ref_inv_dice(logits, targets))

    # modest second shape (147456 elems -> 1152 lane-rows), single-block path
    shape2 = (2, 4, 96, 192)
    logits2 = jax.random.normal(k3, shape2, dtype=jnp.float32)
    targets2 = jax.random.bernoulli(k4, 0.5, shape2).astype(jnp.float32)
    ref2 = _ref_inv_dice(logits2, targets2)
    loss2 = jax.block_until_ready(inv_dice_loss(logits2, targets2))
    _check(loss2, ref2)

    # same data, small block_rows override to exercise the tiled path:
    # 1152 rows / 256-row blocks -> 5 blocks, 3 per split: exercises the core
    # split, the index-map clamping and the ragged-block mask.
    loss2t = jax.block_until_ready(
        inv_dice_loss(logits2, targets2, block_rows=256))
    _check(loss2t, ref2)

    # 288-row blocks -> exactly 4 blocks, 2 per split: static no-mask fast path.
    loss2u = jax.block_until_ready(
        inv_dice_loss(logits2, targets2, block_rows=288))
    _check(loss2u, ref2)

    # non-128-aligned element count -> padded fallback path
    shape3 = (2, 4, 5, 5)
    logits3 = jax.random.normal(k5, shape3, dtype=jnp.float32)
    targets3 = jax.random.bernoulli(k6, 0.5, shape3).astype(jnp.float32)
    loss3 = jax.block_until_ready(inv_dice_loss(logits3, targets3))
    _check(loss3, _ref_inv_dice(logits3, targets3))

    print("KERNEL_OK")
</pallas_src>

<mosaic_0001>
module attributes {stable_mosaic.version = 11 : i64} {
  func.func @_invdice_single_kernel(%arg0: memref<16x128xf32, #tpu.memory_space<vmem>>, %arg1: memref<16x128xf32, #tpu.memory_space<vmem>>, %arg2: memref<1x1xf32, #tpu.memory_space<vmem>>) attributes {dimension_semantics = [], scalar_prefetch = 0 : i64, scratch_operands = 0 : i64, tpu.core_type = #tpu.core_type<tc>} {
    %c0 = arith.constant 0 : index
    %c0_0 = arith.constant 0 : index
    %0 = vector.load %arg0[%c0, %c0_0] : memref<16x128xf32, #tpu.memory_space<vmem>>, vector<16x128xf32>
    %c0_1 = arith.constant 0 : index
    %c0_2 = arith.constant 0 : index
    %1 = vector.load %arg1[%c0_1, %c0_2] : memref<16x128xf32, #tpu.memory_space<vmem>>, vector<16x128xf32>
    %cst = arith.constant 5.000000e-01 : f32
    %2 = vector.broadcast %cst : f32 to vector<16x128xf32>
    %3 = arith.mulf %2, %0 : vector<16x128xf32>
    %4 = math.tanh %3 : vector<16x128xf32>
    %cst_3 = arith.constant 5.000000e-01 : f32
    %5 = vector.broadcast %cst_3 : f32 to vector<16x128xf32>
    %6 = arith.mulf %5, %4 : vector<16x128xf32>
    %cst_4 = arith.constant 5.000000e-01 : f32
    %7 = vector.broadcast %cst_4 : f32 to vector<16x128xf32>
    %8 = arith.subf %7, %6 : vector<16x128xf32>
    %cst_5 = arith.constant 1.000000e+00 : f32
    %9 = vector.broadcast %cst_5 : f32 to vector<16x128xf32>
    %10 = arith.subf %9, %1 : vector<16x128xf32>
    %11 = arith.mulf %8, %10 : vector<16x128xf32>
    %12 = vector.shape_cast %11 : vector<16x128xf32> to vector<1x16x128xf32>
    %cst_6 = arith.constant dense<0.000000e+00> : vector<1xf32>
    %13 = vector.multi_reduction <add>, %12, %cst_6 [1, 2] : vector<1x16x128xf32> to vector<1xf32>
    %14 = vector.shape_cast %13 : vector<1xf32> to vector<1x1x1xf32>
    %15 = vector.extract %14[0, 0, 0] : f32 from vector<1x1x1xf32>
    %16 = arith.addf %8, %10 : vector<16x128xf32>
    %17 = vector.shape_cast %16 : vector<16x128xf32> to vector<1x16x128xf32>
    %cst_7 = arith.constant dense<0.000000e+00> : vector<1xf32>
    %18 = vector.multi_reduction <add>, %17, %cst_7 [1, 2] : vector<1x16x128xf32> to vector<1xf32>
    %19 = vector.shape_cast %18 : vector<1xf32> to vector<1x1x1xf32>
    %20 = vector.extract %19[0, 0, 0] : f32 from vector<1x1x1xf32>
    %cst_8 = arith.constant 2.000000e+00 : f32
    %21 = arith.mulf %cst_8, %15 : f32
    %cst_9 = arith.constant 1.000000e-10 : f32
    %22 = arith.addf %21, %cst_9 : f32
    %cst_10 = arith.constant 1.000000e-10 : f32
    %23 = arith.addf %20, %cst_10 : f32
    %24 = arith.divf %22, %23 : f32
    %cst_11 = arith.constant 1.000000e+00 : f32
    %25 = arith.subf %cst_11, %24 : f32
    %26 = vector.broadcast %25 : f32 to vector<1x1xf32>
    %c0_12 = arith.constant 0 : index
    %c0_13 = arith.constant 0 : index
    %27 = vector.load %arg2[%c0_12, %c0_13] : memref<1x1xf32, #tpu.memory_space<vmem>>, vector<1x1xf32>
    tpu.vector_store %arg2[%c0_12, %c0_13], %26 {strides = array<i32>} : memref<1x1xf32, #tpu.memory_space<vmem>>, vector<1x1xf32>,
    return
  }
}

</mosaic_0001>

<bundles_post_ra>
// kernel: tpu_custom_call.1
= control target key start
LH: loop header
LB: loop body
LE: loop exit
PB: predicated region body
PF: predicated region fallthrough
CT: control target
= control target key end

     0   :  { %7 = vsyncpa [#allocation3], 0  ;;  %s248_s0 = inlined_call_operand.hbm [shape: f32[16,128], index: 0, kind: input, shape index: {}]   ;;  %s249_s1 = inlined_call_operand.hbm [shape: f32[16,128], index: 1, kind: input, shape index: {}]   ;;  %s250_s2 = inlined_call_operand.hbm [shape: f32[1,1], index: 2, kind: output, shape index: {}]  }
   0x1   :  { %8 = vsyncpa [#allocation6], 0 }
   0x2   :  { %9 = vsyncpa [#allocation4], 0  ;;  %s14_s11 = sshll.u32 %s248_s0, 4  ;;  %s219_s12 = smov [#allocation2]   ;;  %s15_s11 = int_to_ptr.hbm [resolvable:$true] %s14_s11 }
   0x3   :  { %s16_s13 = sshll.u32 %s219_s12, 4  ;;  %s27_s16 = sshll.u32 %s249_s1, 4  ;;  %s17_s13 = int_to_ptr.vmem [resolvable:$true] %s16_s13  ;;  %s28_s16 = int_to_ptr.hbm [resolvable:$true] %s27_s16 }
   0x4   :  { %s220_s17 = smov 128   ;;  %s221_s18 = smov 8  }
   0x5   :  { %22 = dma.hbm_to_vmem [thread:$0]  %s15_s11, 256, %s17_s13, [#allocation3], %s220_s17, %s220_s17, %s221_s18  }
   0x6   :  { %s222_s19 = smov [#allocation5]  }
   0x7   :  { %s29_s20 = sshll.u32 %s222_s19, 4  ;;  %s30_s20 = int_to_ptr.vmem [resolvable:$true] %s29_s20 }
   0x8   :  { %35 = dma.hbm_to_vmem [thread:$0]  %s28_s16, 256, %s30_s20, [#allocation6], %s220_s17, %s220_s17, %s221_s18  }
   0x9   :  { %213 = dma.done.wait [#allocation3], 256  }
   0xa   :  { %214 = vsyncadd [#allocation3], 4294967040 }
   0xb   :  { %215 = dma.done.wait [#allocation6], 256  }
   0xc   :  { %216 = vsyncadd [#allocation6], 4294967040  ;;  %v44_v0 = vld [vmem:[#allocation2] sm:$0xff]  ;;  %v45_v1 = vld [vmem:[#allocation2 + $0x8] sm:$0xff]  ;;  %s223_s25 = smov [#allocation7]   ;;  %s113_s30 = sshll.u32 %s250_s2, 4  ;;  %s114_s30 = int_to_ptr.hbm [resolvable:$true] %s113_s30 }
   0xd   :  { %v48_v2 = vmul.f32 0.5, %v44_v0  ;;  %v49_v3 = vmul.f32 0.5, %v45_v1  ;;  %v46_v4 = vld [vmem:[#allocation5] sm:$0xff]  ;;  %v47_v5 = vld [vmem:[#allocation5 + $0x8] sm:$0xff]  ;;  %s111_s26 = sshll.u32 %s223_s25, 4  ;;  %vm104_vm4 = vcmask 0   ;;  %s112_s26 = int_to_ptr.vmem [resolvable:$true] %s111_s26 }
   0xe   :  { %v56_v9 = vsub.f32 1.0, %v46_v4  ;;  %v57_v11 = vsub.f32 1.0, %v47_v5 }
   0xf   :  { %135 = vtanh.f32 %v48_v2 }
  0x10   :  { %137 = vtanh.f32 %v49_v3 }
  0x15   :  { %v136_v6 = vpop.eup %135 }
  0x16   :  { %v138_v7 = vpop.eup %137  ;;  %v52_v8 = vmul.f32 0.5, %v136_v6 }
  0x17   :  { %v53_v10 = vmul.f32 0.5, %v138_v7 }
  0x18   :  { %v54_v12 = vsub.f32 0.5, %v52_v8 }
  0x19   :  { %v55_v13 = vsub.f32 0.5, %v53_v10 }
  0x1a   :  { %v58_v14 = vmul.f32 %v56_v9, %v54_v12  ;;  %v70_v17 = vadd.f32 %v56_v9, %v54_v12 }
  0x1b   :  { %v59_v15 = vmul.f32 %v57_v11, %v55_v13  ;;  %v71_v18 = vadd.f32 %v57_v11, %v55_v13 }
  0x1d   :  { %v60_v16 = vadd.f32 %v59_v15, %v58_v14  ;;  %v72_v19 = vadd.f32 %v71_v18, %v70_v17 }
  0x1f   :  { %61 = vadd.xlane.f32.xlu0 %v60_v16 }
  0x27   :  { %73 = vadd.xlane.f32.xlu0 %v72_v19 }
  0x92   :  { %v62_v20 = vpop.xlane.xlu0 %61 }
  0x93   :  { %v63_v21 = vrot.slane %v62_v20, 4 }
  0x95   :  { %v64_v22 = vadd.f32 %v63_v21, %v62_v20 }
  0x97   :  { %v65_v23 = vrot.slane %v64_v22, 2 }
  0x99   :  { %v66_v24 = vadd.f32 %v65_v23, %v64_v22 }
  0x9a   :  { %v74_v25 = vpop.xlane.xlu0 %73 }
  0x9b   :  { %v75_v26 = vrot.slane %v74_v25, 4  ;;  %v67_v27 = vrot.slane %v66_v24, 1 }
  0x9d   :  { %v76_v28 = vadd.f32 %v75_v26, %v74_v25  ;;  %v68_v29 = vadd.f32 %v67_v27, %v66_v24 }
  0x9f   :  { %v77_v30 = vrot.slane %v76_v28, 2  ;;  %124 = vpush %v68_v29 }
  0xa1   :  { %v78_v31 = vadd.f32 %v77_v30, %v76_v28 }
  0xa3   :  { %v79_v32 = vrot.slane %v78_v31, 1 }
  0xa5   :  { %v80_v33 = vadd.f32 %v79_v32, %v78_v31 }
  0xa7   :  { %126 = vpush %v80_v33 }
  0xd0   :  { %s125_s0 = spop %124 }
  0xd1   :  { %s82_s22 = smul.f32 2.0, %s125_s0 }
  0xd3   :  { %s83_s23 = sadd.f32 1e-10, %s82_s22 }
  0xd8   :  { %s127_s1 = spop %126 }
  0xd9   :  { %s84_s21 = sadd.f32 1e-10, %s127_s1 }
  0xdb   :  { %v85_v34 = vstv %s84_s21 }
  0xdc   :  { %139 = vrcp.f32 %v85_v34  ;;  %v97_v38 = vand.u32 2147483648, %v85_v34  ;;  %v95_v40 = vand.u32 2147483647, %v85_v34  ;;  %vm91_vm1 = vweird.f32 %v85_v34 }
  0xde   :  { %v98_v42 = vor.u32 1.1754944e-38, %v97_v38  ;;  %vm96_vm3 = vcmp.eq.f32.partialorder %v95_v40, 8.507059e+37 }
  0xe2   :  { %v140_v35 = vpop.eup %139 }
  0xe3   :  { %v87_v36 = vmul.f32 %v140_v35, %v85_v34  ;;  %vm92_vm0 = vweird.f32 %v140_v35 }
  0xe4   :  { %vm93_vm2 = vmor %vm91_vm1, %vm92_vm0 }
  0xe5   :  { %v88_v37 = vsub.f32 1.0, %v87_v36 }
  0xe7   :  { %v89_v39 = vmul.f32 %v140_v35, %v88_v37 }
  0xe9   :  { %v90_v41 = vadd.f32 %v140_v35, %v89_v39 }
  0xeb   :  { %v94_v43 = vsel %vm93_vm2, %v140_v35, %v90_v41 }
  0xec   :  { %v99_v44 = vsel %vm96_vm3, %v98_v42, %v94_v43 }
  0xed   :  { %128 = vpush %v99_v44 }
 0x11e   :  { %s129_s24 = spop %128 }
 0x11f   :  { %s101_s27 = smul.f32 %s129_s24, %s83_s23 }
 0x121   :  { %s102_s3 = ssub.f32 1.0, %s101_s27 }
 0x123   :  { %v103_v45 = vstv %s102_s3 }
 0x124   :  { %105 = vst.msk [vmem:[#allocation7] sm:$0x1] %vm104_vm4, %v103_v45 }
 0x125   :  { %116 = dma.vmem_to_hbm [thread:$0]  %s112_s26, 16, %s114_s30, [#allocation4]  }
 0x126   :  { %217 = dma.done.wait [#allocation4], 16  }
 0x127   :  { %218 = vsyncadd [#allocation4], 4294967280 }
 0x128   :  { %121 = vsyncpa [#allocation3], 1 }
 0x129   :  { %122 = vsyncpa [#allocation6], 1 }
 0x12a   :  { %123 = vsyncpa [#allocation4], 1 }

</bundles_post_ra>
